<compile_context>
chip_gen: v6e
topology: v6e:2x2x1
jax: 0.10.0
libtpu: 0.0.40
codegen_flags: <defaults>
</compile_context>

<pallas_src>
import functools

import jax
import jax.numpy as jnp
from jax.experimental import pallas as pl
from jax.experimental.pallas import tpu as pltpu


def _round_up(x, m):
    return ((x + m - 1) // m) * m


def _disc_loss_kernel(real_ref, fake_ref, out_ref, *, n_elems, block_rows,
                      blocks_per_chunk):
    """Accumulate per-block partial sums of (real-1)^2 + fake^2.

    real_ref / fake_ref : (block_rows, 128) input tiles (original dtype),
                          auto-pipelined by BlockSpec.
    out_ref             : (8, 128) f32 partial-sum accumulator for the current
                          chunk (resident across the inner "arbitrary" axis).
    """
    c = pl.program_id(0)  # chunk index ("parallel" axis)
    s = pl.program_id(1)  # block index within the chunk ("arbitrary" axis)

    @pl.when(s == 0)
    def _init():
        out_ref[...] = jnp.zeros_like(out_ref)

    block_elems = block_rows * 128
    # Nominal global element offset of this block (before index clamping).
    # int32 scalar math: fine for any realistic patchGAN score-map size.
    start = (c * blocks_per_chunk + s) * block_elems

    def _accumulate(mask):
        r = real_ref[...].astype(jnp.float32)
        f = fake_ref[...].astype(jnp.float32)
        contrib = (r - 1.0) * (r - 1.0) + f * f
        if mask is not None:
            contrib = jnp.where(mask, contrib, 0.0)
        # Fold (block_rows, 128) -> (8, 128) with pure VPU adds; the cross-lane
        # reduction only happens once, on a tiny array, in the wrapper.
        partial = contrib.reshape(block_rows // 8, 8, 128).sum(axis=0)
        out_ref[...] += partial

    fully_valid = start + block_elems <= n_elems

    @pl.when(fully_valid)
    def _fast():
        _accumulate(None)

    @pl.when(jnp.logical_not(fully_valid))
    def _tail():
        # Last (or clamped duplicate) block: mask out lane padding, block
        # overhang and any duplicated elements via the nominal global index.
        row = jax.lax.broadcasted_iota(jnp.int32, (block_rows, 128), 0)
        col = jax.lax.broadcasted_iota(jnp.int32, (block_rows, 128), 1)
        idx = start + row * 128 + col
        _accumulate(idx < n_elems)


def discriminator_loss(real_scores, fake_scores, *, block_rows=512,
                       min_pallas_elems=1024):
    assert real_scores.shape == fake_scores.shape
    n = int(real_scores.size)

    if n < min_pallas_elems:
        # Tiny score maps: per-pallas_call/grid-step overhead dwarfs ~1 vreg of
        # work; let XLA's fused reduction handle it. (Threshold kept low so the
        # demo shapes below exercise the Pallas path.)
        r = real_scores.astype(jnp.float32)
        f = fake_scores.astype(jnp.float32)
        return 0.5 * (jnp.mean(f * f) + jnp.mean((r - 1.0) * (r - 1.0)))

    # Flatten (free for contiguous arrays); keep the input dtype — the f32 cast
    # happens in-VMEM inside the kernel.
    real_flat = real_scores.reshape(-1)
    fake_flat = fake_scores.reshape(-1)

    # Only a <=127-element lane pad when n is not a multiple of 128; padded
    # values (and block overhang) are masked inside the kernel.
    rem = n % 128
    if rem:
        pad = 128 - rem
        real_flat = jnp.pad(real_flat, (0, pad))
        fake_flat = jnp.pad(fake_flat, (0, pad))
    rows = real_flat.shape[0] // 128

    real2d = real_flat.reshape(rows, 128)
    fake2d = fake_flat.reshape(rows, 128)

    # Block = (512, 128): 256 KiB/input/buffer for f32, so 2 inputs x 2 pipeline
    # buffers stay far under the scoped-VMEM limit on v5e/v6e/v7x while big
    # enough to sit near the HBM roofline. Small inputs shrink to one block.
    sub = 8 * max(1, 4 // jnp.dtype(real_scores.dtype).itemsize)
    br = min(block_rows, _round_up(rows, sub))
    total_blocks = -(-rows // br)

    # Leading "parallel" axis: 2 independent chunks so both TensorCores on v7x
    # can stream; harmless on single-TC v5e/v6e.
    num_chunks = 2 if total_blocks >= 2 else 1
    bpc = -(-total_blocks // num_chunks)

    def in_map(c, s):
        # Clamp so a (possible) overflow block in the last chunk stays in
        # bounds; its contribution is masked to zero inside the kernel.
        return (jnp.minimum(c * bpc + s, total_blocks - 1), 0)

    kernel = functools.partial(_disc_loss_kernel, n_elems=n, block_rows=br,
                               blocks_per_chunk=bpc)

    in_bytes = (real2d.size + fake2d.size) * real2d.dtype.itemsize
    partials = pl.pallas_call(
        kernel,
        out_shape=jax.ShapeDtypeStruct((num_chunks * 8, 128), jnp.float32),
        grid=(num_chunks, bpc),
        in_specs=[pl.BlockSpec((br, 128), in_map),
                  pl.BlockSpec((br, 128), in_map)],
        out_specs=pl.BlockSpec((8, 128), lambda c, s: (c, 0)),
        compiler_params=pltpu.CompilerParams(
            dimension_semantics=("parallel", "arbitrary")),
        cost_estimate=pl.CostEstimate(
            flops=6 * n, transcendentals=0,
            bytes_accessed=in_bytes + num_chunks * 8 * 128 * 4),
    )(real2d, fake2d)

    # Final tiny reduction + scale: 0.5 * (sum_fake^2 + sum_(real-1)^2) / n.
    return (0.5 / n) * jnp.sum(partials)


if __name__ == "__main__":
    key = jax.random.PRNGKey(0)

    def ref_loss(real, fake):
        r = real.astype(jnp.float32)
        f = fake.astype(jnp.float32)
        return 0.5 * (jnp.mean(f * f) + jnp.mean((r - 1.0) ** 2))

    shapes = [
        (2, 4, 16, 16),    # 2048 elems  : single-block Pallas path
        (3, 1, 30, 30),    # 2700 elems  : n % 128 != 0 -> in-kernel tail mask
        (2, 1, 256, 256),  # 131072 elems: multi-block grid + 2-chunk parallel split
    ]
    for shape in shapes:
        key, kr, kf = jax.random.split(key, 3)
        real = jax.random.normal(kr, shape, dtype=jnp.float32)
        fake = jax.random.normal(kf, shape, dtype=jnp.float32)

        loss = jax.block_until_ready(discriminator_loss(real, fake))
        ref = jax.block_until_ready(ref_loss(real, fake))
        assert jnp.allclose(loss, ref, rtol=1e-5, atol=1e-6), (shape, loss, ref)

    print("KERNEL_OK")
</pallas_src>

<mosaic_0001>
module attributes {stable_mosaic.version = 11 : i64} {
  func.func @_disc_loss_kernel(%arg0: i32, %arg1: i32, %arg2: memref<16x128xf32, #tpu.memory_space<vmem>>, %arg3: memref<16x128xf32, #tpu.memory_space<vmem>>, %arg4: memref<8x128xf32, #tpu.memory_space<vmem>>) attributes {dimension_semantics = [#tpu.dimension_semantics<parallel>, #tpu.dimension_semantics<arbitrary>], iteration_bounds = array<i64: 1, 1>, scalar_prefetch = 0 : i64, scratch_operands = 0 : i64, tpu.core_type = #tpu.core_type<tc>, window_params = [{transform_indices = @transform_0, window_bounds = array<i64: 16, 128>}, {transform_indices = @transform_1, window_bounds = array<i64: 16, 128>}, {transform_indices = @transform_2, window_bounds = array<i64: 8, 128>}]} {
    %c0_i32 = arith.constant 0 : i32
    %0 = arith.cmpi eq, %arg1, %c0_i32 : i32
    %1 = arith.extui %0 : i1 to i32
    %c0_i32_0 = arith.constant 0 : i32
    %2 = arith.cmpi ne, %1, %c0_i32_0 : i32
    scf.if %2 {
      %cst = arith.constant 0.000000e+00 : f32
      %13 = vector.broadcast %cst : f32 to vector<8x128xf32>
      %c0 = arith.constant 0 : index
      %c0_5 = arith.constant 0 : index
      %14 = vector.load %arg4[%c0, %c0_5] : memref<8x128xf32, #tpu.memory_space<vmem>>, vector<8x128xf32>
      tpu.vector_store %arg4[%c0, %c0_5], %13 {strides = array<i32>} : memref<8x128xf32, #tpu.memory_space<vmem>>, vector<8x128xf32>,
    } else {
    }
    %c1_i32 = arith.constant 1 : i32
    %3 = arith.muli %arg0, %c1_i32 : i32
    %4 = arith.addi %3, %arg1 : i32
    %c2048_i32 = arith.constant 2048 : i32
    %5 = arith.muli %4, %c2048_i32 : i32
    %c2048_i32_1 = arith.constant 2048 : i32
    %6 = arith.addi %5, %c2048_i32_1 : i32
    %c2048_i32_2 = arith.constant 2048 : i32
    %7 = arith.cmpi sle, %6, %c2048_i32_2 : i32
    %8 = arith.extui %7 : i1 to i32
    %c0_i32_3 = arith.constant 0 : i32
    %9 = arith.cmpi ne, %8, %c0_i32_3 : i32
    scf.if %9 {
      %c0 = arith.constant 0 : index
      %c0_5 = arith.constant 0 : index
      %13 = vector.load %arg2[%c0, %c0_5] : memref<16x128xf32, #tpu.memory_space<vmem>>, vector<16x128xf32>
      %c0_6 = arith.constant 0 : index
      %c0_7 = arith.constant 0 : index
      %14 = vector.load %arg3[%c0_6, %c0_7] : memref<16x128xf32, #tpu.memory_space<vmem>>, vector<16x128xf32>
      %cst = arith.constant 1.000000e+00 : f32
      %15 = vector.broadcast %cst : f32 to vector<16x128xf32>
      %16 = arith.subf %13, %15 : vector<16x128xf32>
      %cst_8 = arith.constant 1.000000e+00 : f32
      %17 = vector.broadcast %cst_8 : f32 to vector<16x128xf32>
      %18 = arith.subf %13, %17 : vector<16x128xf32>
      %19 = arith.mulf %16, %18 : vector<16x128xf32>
      %20 = arith.mulf %14, %14 : vector<16x128xf32>
      %21 = arith.addf %19, %20 : vector<16x128xf32>
      %22 = vector.shape_cast %21 : vector<16x128xf32> to vector<2x8x128xf32>
      %cst_9 = arith.constant dense<0.000000e+00> : vector<8x128xf32>
      %23 = vector.multi_reduction <add>, %22, %cst_9 [0] : vector<2x8x128xf32> to vector<8x128xf32>
      %c0_10 = arith.constant 0 : index
      %c0_11 = arith.constant 0 : index
      %24 = vector.load %arg4[%c0_10, %c0_11] : memref<8x128xf32, #tpu.memory_space<vmem>>, vector<8x128xf32>
      %25 = arith.addf %24, %23 : vector<8x128xf32>
      %c0_12 = arith.constant 0 : index
      %c0_13 = arith.constant 0 : index
      %26 = vector.load %arg4[%c0_12, %c0_13] : memref<8x128xf32, #tpu.memory_space<vmem>>, vector<8x128xf32>
      tpu.vector_store %arg4[%c0_12, %c0_13], %25 {strides = array<i32>} : memref<8x128xf32, #tpu.memory_space<vmem>>, vector<8x128xf32>,
    } else {
    }
    %true = arith.constant true
    %10 = arith.xori %7, %true : i1
    %11 = arith.extui %10 : i1 to i32
    %c0_i32_4 = arith.constant 0 : i32
    %12 = arith.cmpi ne, %11, %c0_i32_4 : i32
    scf.if %12 {
      %13 = tpu.iota {dimensions = array<i32: 0>} : vector<16x128xi32>
      %14 = tpu.iota {dimensions = array<i32: 1>} : vector<16x128xi32>
      %c128_i32 = arith.constant 128 : i32
      %15 = vector.broadcast %c128_i32 : i32 to vector<16x128xi32>
      %16 = arith.muli %13, %15 : vector<16x128xi32>
      %17 = vector.broadcast %5 : i32 to vector<16x128xi32>
      %18 = arith.addi %17, %16 : vector<16x128xi32>
      %19 = arith.addi %18, %14 : vector<16x128xi32>
      %c2048_i32_5 = arith.constant 2048 : i32
      %20 = vector.broadcast %c2048_i32_5 : i32 to vector<16x128xi32>
      %21 = arith.cmpi slt, %19, %20 : vector<16x128xi32>
      %c0 = arith.constant 0 : index
      %c0_6 = arith.constant 0 : index
      %22 = vector.load %arg2[%c0, %c0_6] : memref<16x128xf32, #tpu.memory_space<vmem>>, vector<16x128xf32>
      %c0_7 = arith.constant 0 : index
      %c0_8 = arith.constant 0 : index
      %23 = vector.load %arg3[%c0_7, %c0_8] : memref<16x128xf32, #tpu.memory_space<vmem>>, vector<16x128xf32>
      %cst = arith.constant 1.000000e+00 : f32
      %24 = vector.broadcast %cst : f32 to vector<16x128xf32>
      %25 = arith.subf %22, %24 : vector<16x128xf32>
      %cst_9 = arith.constant 1.000000e+00 : f32
      %26 = vector.broadcast %cst_9 : f32 to vector<16x128xf32>
      %27 = arith.subf %22, %26 : vector<16x128xf32>
      %28 = arith.mulf %25, %27 : vector<16x128xf32>
      %29 = arith.mulf %23, %23 : vector<16x128xf32>
      %30 = arith.addf %28, %29 : vector<16x128xf32>
      %cst_10 = arith.constant 0.000000e+00 : f32
      %31 = vector.broadcast %cst_10 : f32 to vector<16x128xf32>
      %32 = arith.select %21, %30, %31 : vector<16x128xi1>, vector<16x128xf32>
      %33 = vector.shape_cast %32 : vector<16x128xf32> to vector<2x8x128xf32>
      %cst_11 = arith.constant dense<0.000000e+00> : vector<8x128xf32>
      %34 = vector.multi_reduction <add>, %33, %cst_11 [0] : vector<2x8x128xf32> to vector<8x128xf32>
      %c0_12 = arith.constant 0 : index
      %c0_13 = arith.constant 0 : index
      %35 = vector.load %arg4[%c0_12, %c0_13] : memref<8x128xf32, #tpu.memory_space<vmem>>, vector<8x128xf32>
      %36 = arith.addf %35, %34 : vector<8x128xf32>
      %c0_14 = arith.constant 0 : index
      %c0_15 = arith.constant 0 : index
      %37 = vector.load %arg4[%c0_14, %c0_15] : memref<8x128xf32, #tpu.memory_space<vmem>>, vector<8x128xf32>
      tpu.vector_store %arg4[%c0_14, %c0_15], %36 {strides = array<i32>} : memref<8x128xf32, #tpu.memory_space<vmem>>, vector<8x128xf32>,
    } else {
    }
    return
  }
  func.func @transform_0(%arg0: i32, %arg1: i32) -> (i32, i32) {
    %c1_i32 = arith.constant 1 : i32
    %0 = arith.muli %arg0, %c1_i32 : i32
    %1 = arith.addi %0, %arg1 : i32
    %c0_i32 = arith.constant 0 : i32
    %2 = arith.minsi %1, %c0_i32 : i32
    %c0_i32_0 = arith.constant 0 : i32
    %c0_i32_1 = arith.constant 0 : i32
    return %2, %c0_i32_0 : i32, i32
  }
  func.func @transform_1(%arg0: i32, %arg1: i32) -> (i32, i32) {
    %c1_i32 = arith.constant 1 : i32
    %0 = arith.muli %arg0, %c1_i32 : i32
    %1 = arith.addi %0, %arg1 : i32
    %c0_i32 = arith.constant 0 : i32
    %2 = arith.minsi %1, %c0_i32 : i32
    %c0_i32_0 = arith.constant 0 : i32
    %c0_i32_1 = arith.constant 0 : i32
    return %2, %c0_i32_0 : i32, i32
  }
  func.func @transform_2(%arg0: i32, %arg1: i32) -> (i32, i32) {
    %c0_i32 = arith.constant 0 : i32
    %c0_i32_0 = arith.constant 0 : i32
    return %arg0, %c0_i32 : i32, i32
  }
}

</mosaic_0001>

<bundles_post_ra>
// kernel: tpu_custom_call.1
= control target key start
LH: loop header
LB: loop body
LE: loop exit
PB: predicated region body
PF: predicated region fallthrough
CT: control target
= control target key end

     0   :  { %7 = vsyncpa [#allocation3], 0  ;;  %s249_s0 = inlined_call_operand.hbm [shape: f32[16,128], index: 0, kind: input, shape index: {}]   ;;  %s250_s1 = inlined_call_operand.hbm [shape: f32[16,128], index: 1, kind: input, shape index: {}]   ;;  %s251_s2 = inlined_call_operand.hbm [shape: f32[8,128], index: 2, kind: output, shape index: {}]  }
   0x1   :  { %8 = vsyncpa [#allocation6], 0 }
   0x2   :  { %9 = vsyncpa [#allocation4], 0  ;;  %s220_s9 = smov [#allocation2]  }
   0x3   :  { %s21_s10 = sshll.u32 %s220_s9, 4  ;;  %s22_s10 = int_to_ptr.vmem [resolvable:$true] %s21_s10 }
   0x4   :  { %s162_s11 = scalar_lea.vmem %s22_s10, 256  ;;  %p167_p1 = scmp.lt.s32.totalorder %s22_s10, %s22_s10 }
   0x5   :  { %p163_p0 = scmp.ne.s32.totalorder %s22_s10, %s162_s11  ;;  %p168_p2 = scmp.lt.s32.totalorder %s162_s11, %s162_s11 }
   0x7   :  { %p169_p3 = por %p168_p2, %p167_p1 }
   0x9   :  { %p170_p4 = pnand %p169_p3, %p163_p0 }
   0xb   :  { %173 = shalt.err (!%p170_p4)
}
   0xc   :  { %s221_s12 = smov 128   ;;  %s222_s13 = smov 8  }
   0xd   :  { %27 = dma.hbm_to_vmem [thread:$0]  %s249_s0, 256, %s22_s10, [#allocation3], %s221_s12, %s221_s12, %s222_s13  }
   0xe   :  { %s223_s16 = smov [#allocation5]  }
   0xf   :  { %s39_s17 = sshll.u32 %s223_s16, 4  ;;  %s40_s17 = int_to_ptr.vmem [resolvable:$true] %s39_s17 }
  0x10   :  { %s182_s18 = scalar_lea.vmem %s40_s17, 256  ;;  %p187_p6 = scmp.lt.s32.totalorder %s40_s17, %s40_s17 }
  0x11   :  { %p183_p5 = scmp.ne.s32.totalorder %s40_s17, %s182_s18  ;;  %p188_p7 = scmp.lt.s32.totalorder %s182_s18, %s182_s18 }
  0x13   :  { %p189_p8 = por %p188_p7, %p187_p6 }
  0x15   :  { %p190_p9 = pnand %p189_p8, %p183_p5 }
  0x17   :  { %193 = shalt.err (!%p190_p9)
}
  0x18   :  { %45 = dma.hbm_to_vmem [thread:$0]  %s250_s1, 256, %s40_s17, [#allocation6], %s221_s12, %s221_s12, %s222_s13  }
  0x19   :  { %214 = dma.done.wait [#allocation3], 256  }
  0x1a   :  { %215 = vsyncadd [#allocation3], 4294967040 }
  0x1b   :  { %216 = dma.done.wait [#allocation6], 256  }
  0x1c   :  { %217 = vsyncadd [#allocation6], 4294967040  ;;  %v72_v0 = vld [vmem:[#allocation2] sm:$0xff]  ;;  %v73_v1 = vld [vmem:[#allocation2 + $0x8] sm:$0xff]  ;;  %s224_s0 = smov [#allocation7]  }
  0x1d   :  { %v74_v2 = vld [vmem:[#allocation5] sm:$0xff]  ;;  %v75_v3 = vld [vmem:[#allocation5 + $0x8] sm:$0xff]  ;;  %v144_v4 = vadd.f32 -1.0, %v72_v0  ;;  %v145_v5 = vadd.f32 -1.0, %v73_v1  ;;  %s130_s21 = sshll.u32 %s224_s0, 4  ;;  %s131_s21 = int_to_ptr.vmem [resolvable:$true] %s130_s21 }
  0x1e   :  { %v80_v6 = vmul.f32 %v74_v2, %v74_v2  ;;  %v81_v7 = vmul.f32 %v75_v3, %v75_v3  ;;  %s194_s1 = scalar_lea.vmem %s131_s21, 128  ;;  %p199_p11 = scmp.lt.s32.totalorder %s131_s21, %s131_s21 }
  0x1f   :  { %v78_v8 = vmul.f32 %v144_v4, %v144_v4  ;;  %v79_v9 = vmul.f32 %v145_v5, %v145_v5  ;;  %p195_p10 = scmp.ne.s32.totalorder %s131_s21, %s194_s1  ;;  %p200_p12 = scmp.lt.s32.totalorder %s194_s1, %s194_s1 }
  0x21   :  { %v82_v10 = vadd.f32 %v80_v6, %v78_v8  ;;  %v83_v11 = vadd.f32 %v81_v7, %v79_v9  ;;  %p201_p13 = por %p200_p12, %p199_p11 }
  0x23   :  { %v84_v12 = vadd.f32 %v83_v11, %v82_v10  ;;  %p202_p0 = pnand %p201_p13, %p195_p10 }
  0x25   :  { %87 = vst [vmem:[#allocation7] sm:$0xff] %v84_v12 }
  0x26   :  { %205 = shalt.err (!%p202_p0)
}
  0x27   :  { %133 = dma.vmem_to_hbm [thread:$0]  %s131_s21, 128, %s251_s2, [#allocation4]  }
  0x28   :  { %218 = dma.done.wait [#allocation4], 128  }
  0x29   :  { %219 = vsyncadd [#allocation4], 4294967168 }
  0x2a   :  { %137 = vsyncpa [#allocation3], 1 }
  0x2b   :  { %138 = vsyncpa [#allocation6], 1 }
  0x2c   :  { %139 = vsyncpa [#allocation4], 1 }

</bundles_post_ra>
